<compile_context>
chip_gen: v6e
topology: v6e:2x2x1
jax: 0.10.0
libtpu: 0.0.40
codegen_flags: <defaults>
</compile_context>

<pallas_src>
import jax
import jax.numpy as jnp
from jax.experimental import pallas as pl
from jax.experimental.pallas import tpu as pltpu


def _round_up(x, m):
    return (x + m - 1) // m * m


def _utterance_decoder_kernel(cond_ref, z_ref, m_ref, q_ref, wc_ref, wz_ref, b_ref,
                              out_ref,
                              mc_sc, lc_sc, accc_sc, mz_sc, lz_sc, accz_sc):
    """One (batch-tile, T-tile) grid step.

      cond_ref, z_ref: (TB, Tt, D) activations (f32 or bf16, streamed as given)
      m_ref:           (TB, Tt) f32 mask (> 0.5 = attend)
      q_ref:           (2, D)  f32  (row 0 = cond query, row 1 = z query)
      wc_ref, wz_ref:  (D, Cp) f32  classifier weight halves (input-major)
      b_ref:           (1, Cp) f32
      out_ref:         (TB, Cp) f32 logits (lane-dense, padded C)
      *_sc:            per-head online-softmax state: running max (TB,1),
                       running denom (TB,1), unnormalized pooled sum (TB,D), all f32.
    """
    t_idx = pl.program_id(1)
    neg_big = jnp.float32(-1e30)

    @pl.when(t_idx == 0)
    def _init():
        mc_sc[...] = jnp.full_like(mc_sc, neg_big)
        mz_sc[...] = jnp.full_like(mz_sc, neg_big)
        lc_sc[...] = jnp.zeros_like(lc_sc)
        lz_sc[...] = jnp.zeros_like(lz_sc)
        accc_sc[...] = jnp.zeros_like(accc_sc)
        accz_sc[...] = jnp.zeros_like(accz_sc)

    tb, tt, d = cond_ref.shape
    # 2D (sublane = batch, lane = time) mask layout, computed once for both heads.
    valid = m_ref[...] > 0.5                                            # (TB, Tt) bool
    # Both queries: cast once to the streaming dtype, broadcast once per grid step.
    qb = jnp.broadcast_to(q_ref[...].astype(cond_ref.dtype)[None], (tb, 2, d))

    def head_update(x_ref, h, m_sc, l_sc, acc_sc):
        x = x_ref[...]                                                  # (TB, Tt, D)
        # Scores on the MXU (f32 accumulate), squeezed to the 2D (TB, Tt) layout.
        s = jnp.einsum('bqd,bkd->bqk', qb[:, h:h + 1, :], x,
                       preferred_element_type=jnp.float32).reshape(tb, tt)
        s = jnp.where(valid, s, neg_big)
        m_prev = m_sc[...]                                              # (TB, 1)
        m_new = jnp.maximum(m_prev, jnp.max(s, axis=-1, keepdims=True))
        alpha = jnp.exp(m_prev - m_new)                                 # (TB, 1)
        # Masked steps contribute exactly 0; fully-masked rows end as 0/0 -> NaN,
        # matching PyTorch's softmax over all -inf.
        p = jnp.where(valid, jnp.exp(s - m_new), jnp.float32(0.0))      # (TB, Tt)
        l_sc[...] = alpha * l_sc[...] + jnp.sum(p, axis=-1, keepdims=True)
        # Unnormalized pooling on the MXU; attention weights cast to the streaming dtype
        # so bf16 activations get a bf16 x bf16 matmul with f32 accumulation.
        pooled = jnp.einsum('bqk,bkd->bqd', p.reshape(tb, 1, tt).astype(x.dtype), x,
                            preferred_element_type=jnp.float32).reshape(tb, d)
        acc_sc[...] = alpha * acc_sc[...] + pooled
        m_sc[...] = m_new

    head_update(cond_ref, 0, mc_sc, lc_sc, accc_sc)
    head_update(z_ref, 1, mz_sc, lz_sc, accz_sc)

    @pl.when(t_idx == pl.num_programs(1) - 1)
    def _finalize():
        # Exact reciprocal: denominators are only (TB, 1), approx=True buys nothing here.
        pooled_c = accc_sc[...] * pl.reciprocal(lc_sc[...])
        pooled_z = accz_sc[...] * pl.reciprocal(lz_sc[...])
        # clf(concat([pc, pz])) == pc @ W[:D] + pz @ W[D:] + b  (no lane-axis concat).
        logits = (jnp.dot(pooled_c, wc_ref[...], preferred_element_type=jnp.float32)
                  + jnp.dot(pooled_z, wz_ref[...], preferred_element_type=jnp.float32)
                  + b_ref[...])
        out_ref[...] = logits.astype(out_ref.dtype)


def _plan_tiles(B, T, D, Cp, act_itemsize, act_budget, batch_tile=None, t_tile=None):
    """Pick (TB, Bp, Tt, Tp).

    Prefers full-extent T blocks (no padded copies at all).  Falls back to a flash-style
    T-tiled grid when even a small batch tile with full T would not fit the double-buffered
    activation budget.  TB is either == B (single batch block) or a multiple of 8 (layout
    rule for the 2D mask / logits blocks), preferring a value that divides B so no
    batch-pad copy is needed.
    """
    def tile_bytes(tb, tt):
        per_row = (2 * 2 * tt * D * act_itemsize   # cond + z tiles, double-buffered
                   + 2 * tt * 4                    # f32 mask tile, double-buffered
                   + 2 * Cp * 4                    # f32 logits tile, double-buffered
                   + 4 * 2 * (2 * 128 + D))        # per-head m/l/acc VMEM scratch
        return tb * per_row

    if batch_tile is not None or t_tile is not None:
        tb = min(B, batch_tile if batch_tile is not None else 8)
        tt = min(T, t_tile if t_tile is not None else T)
        bp = B if (tb == B or B % tb == 0) else _round_up(B, tb)
        tp = T if (tt == T or T % tt == 0) else _round_up(T, tt)
        return tb, bp, tt, tp

    if tile_bytes(min(B, 8), T) <= act_budget:
        cap = max(1, act_budget // tile_bytes(1, T))
        if B >= 16:
            cap = min(cap, B // 2)            # >= 2 batch grid steps (v7x: 2 TensorCores)
        if cap >= B:
            return B, B, T, T
        cap8 = max(8, (cap // 8) * 8)
        for tb in range(cap8, 7, -8):         # prefer a TB dividing B: no batch-pad copy
            if B % tb == 0:
                return tb, B, T, T
        return cap8, _round_up(B, cap8), T, T

    # Fallback for very large T*D: tile T and run the online softmax across T grid steps.
    tb = B if B < 8 else 8
    tt = max(128, (act_budget // max(1, tile_bytes(tb, 1))) // 128 * 128)
    tt = min(tt, _round_up(T, 128))
    while tt > 128 and T % tt != 0:           # prefer a Tt dividing T: no T-pad copy
        tt -= 128
    tp = T if T % tt == 0 else _round_up(T, tt)
    bp = B if B % tb == 0 else _round_up(B, tb)
    return tb, bp, tt, tp


def utterance_decoder(z, m, cond, q_cond, q_z, clf_w, clf_b, *,
                      act_dtype=None, batch_tile=None, t_tile=None, interpret=False):
    """z, cond: (B, T, D) activations (pass bf16 to halve HBM traffic); m: (B, T) mask
    (nonzero / True = attend); q_cond, q_z: (1, D) or (D,); clf_w: (2D, C) (nn.Linear
    weight transposed, input-major); clf_b: (C,) or (1, C).  Returns (B, C) f32 logits."""
    B, T, D = z.shape
    assert cond.shape == (B, T, D)
    C = clf_w.shape[-1]
    f32 = jnp.float32

    if act_dtype is not None:
        z = z.astype(act_dtype)
        cond = cond.astype(act_dtype)
    if z.dtype != cond.dtype:
        z = z.astype(cond.dtype)
    act_itemsize = jnp.dtype(cond.dtype).itemsize

    Cp = _round_up(C, 128)                    # lane-dense logits / classifier tiles

    # VMEM-capacity-aware budgets: v5e/v6e have 128 MiB of VMEM, v7x 64 MiB.
    try:
        vmem_cap = int(pltpu.get_tpu_info().vmem_capacity_bytes)
    except Exception:
        vmem_cap = 64 * 1024 * 1024
    vmem_limit = int(min((vmem_cap * 3) // 4, 100 * 1024 * 1024))
    # Grid-invariant operands (weights, queries, bias) still get default 2x buffers;
    # charge them up front instead of using pipeline_mode overrides.
    fixed_bytes = 2 * (2 * D * Cp * 4 + 2 * D * 4 + 8 * Cp * 4)
    act_budget = max(4 * 1024 * 1024, int(vmem_limit * 0.6) - fixed_bytes)

    TB, Bp, Tt, Tp = _plan_tiles(B, T, D, Cp, act_itemsize, act_budget,
                                 batch_tile, t_tile)

    # Only the rare fallback (no dividing tile found) pays a pad copy of the activations.
    if Bp != B or Tp != T:
        pad3 = ((0, Bp - B), (0, Tp - T), (0, 0))
        cond = jnp.pad(cond, pad3)
        z = jnp.pad(z, pad3)
        mf = jnp.pad(m.astype(f32), ((0, Bp - B), (0, Tp - T)))   # zeros => masked out
    else:
        mf = m.astype(f32)

    # Tiny parameters: stack the queries, split and lane-pad the classifier.
    qs = jnp.concatenate([jnp.reshape(q_cond, (1, D)),
                          jnp.reshape(q_z, (1, D))], axis=0).astype(f32)        # (2, D)
    wc = jnp.zeros((D, Cp), f32).at[:, :C].set(clf_w[:D].astype(f32))
    wz = jnp.zeros((D, Cp), f32).at[:, :C].set(clf_w[D:].astype(f32))
    bb = jnp.zeros((1, Cp), f32).at[0, :C].set(jnp.reshape(clf_b, (-1,)).astype(f32))

    grid = (Bp // TB, Tp // Tt)
    out = pl.pallas_call(
        _utterance_decoder_kernel,
        out_shape=jax.ShapeDtypeStruct((Bp, Cp), f32),
        grid_spec=pltpu.PrefetchScalarGridSpec(
            num_scalar_prefetch=0,
            grid=grid,
            in_specs=[
                pl.BlockSpec((TB, Tt, D), lambda b, t: (b, t, 0)),   # cond
                pl.BlockSpec((TB, Tt, D), lambda b, t: (b, t, 0)),   # z
                pl.BlockSpec((TB, Tt), lambda b, t: (b, t)),         # mask (2D layout)
                pl.BlockSpec((2, D), lambda b, t: (0, 0)),           # stacked queries
                pl.BlockSpec((D, Cp), lambda b, t: (0, 0)),          # clf weight (cond half)
                pl.BlockSpec((D, Cp), lambda b, t: (0, 0)),          # clf weight (z half)
                pl.BlockSpec((1, Cp), lambda b, t: (0, 0)),          # clf bias
            ],
            out_specs=pl.BlockSpec((TB, Cp), lambda b, t: (b, 0)),
            scratch_shapes=[
                pltpu.VMEM((TB, 1), f32), pltpu.VMEM((TB, 1), f32),  # cond head: max, denom
                pltpu.VMEM((TB, D), f32),                            # cond head: pooled acc
                pltpu.VMEM((TB, 1), f32), pltpu.VMEM((TB, 1), f32),  # z head:    max, denom
                pltpu.VMEM((TB, D), f32),                            # z head:    pooled acc
            ],
        ),
        compiler_params=pltpu.CompilerParams(
            dimension_semantics=("parallel", "arbitrary"),
            vmem_limit_bytes=vmem_limit,
        ),
        interpret=interpret,
    )(cond, z, mf, qs, wc, wz, bb)

    return out[:B, :C]


def utterance_decoder_ref(z, m, cond, q_cond, q_z, clf_w, clf_b):
    """Pure-JAX reference matching the PyTorch forward (f32 math)."""
    z = z.astype(jnp.float32)
    cond = cond.astype(jnp.float32)

    def attn(x, q):
        scores = jnp.einsum("btd,od->bt", x, jnp.reshape(q, (1, -1)).astype(jnp.float32))
        scores = jnp.where(m > 0.5, scores, -jnp.inf)
        w = jax.nn.softmax(scores, axis=-1)[..., None]
        return jnp.sum(w * x, axis=1)

    pooled = jnp.concatenate([attn(cond, q_cond), attn(z, q_z)], axis=-1)
    return pooled @ clf_w.astype(jnp.float32) + clf_b.astype(jnp.float32)


if __name__ == "__main__":
    # --- Test 1: tiny config matching the module defaults, f32 activations. -------------
    B, T, D, C = 2, 8, 32, 5
    key = jax.random.PRNGKey(0)
    k_z, k_cond, k_w, k_b = jax.random.split(key, 4)

    z = jax.random.normal(k_z, (B, T, D), dtype=jnp.float32)
    cond = jax.random.normal(k_cond, (B, T, D), dtype=jnp.float32)
    m = jnp.ones((B, T), dtype=jnp.float32).at[1, T - 3:].set(0.0)   # ragged mask
    q_cond = jnp.ones((1, D), dtype=jnp.float32)                     # torch.ones(1, D) init
    q_z = jnp.ones((1, D), dtype=jnp.float32)
    clf_w = jax.random.normal(k_w, (2 * D, C), jnp.float32) / jnp.sqrt(2.0 * D)
    clf_b = jax.random.normal(k_b, (1, C), jnp.float32) * 0.01

    logits = utterance_decoder(z, m, cond, q_cond, q_z, clf_w, clf_b)
    jax.block_until_ready(logits)
    ref = utterance_decoder_ref(z, m, cond, q_cond, q_z, clf_w, clf_b)
    assert logits.shape == (B, C)
    assert jnp.allclose(logits, ref, atol=5e-4, rtol=5e-4), (logits, ref)

    # --- Test 2: bf16 streaming + T-tiled online softmax (2 batch x 2 time grid steps). --
    B2, T2, D2, C2 = 16, 256, 128, 10
    k_z2, k_cond2, k_w2, k_b2, k_q1, k_q2 = jax.random.split(jax.random.PRNGKey(0), 6)
    z2 = jax.random.normal(k_z2, (B2, T2, D2), jnp.float32).astype(jnp.bfloat16)
    cond2 = jax.random.normal(k_cond2, (B2, T2, D2), jnp.float32).astype(jnp.bfloat16)
    lengths = 1 + (jnp.arange(B2) * 37) % T2          # ragged valid lengths, all >= 1
    m2 = (jnp.arange(T2)[None, :] < lengths[:, None]).astype(jnp.float32)
    q_cond2 = jax.random.normal(k_q1, (1, D2), jnp.float32) * 0.1
    q_z2 = jax.random.normal(k_q2, (1, D2), jnp.float32) * 0.1
    clf_w2 = jax.random.normal(k_w2, (2 * D2, C2), jnp.float32) / jnp.sqrt(2.0 * D2)
    clf_b2 = jax.random.normal(k_b2, (1, C2), jnp.float32) * 0.01

    logits2 = utterance_decoder(z2, m2, cond2, q_cond2, q_z2, clf_w2, clf_b2, t_tile=128)
    jax.block_until_ready(logits2)
    ref2 = utterance_decoder_ref(z2, m2, cond2, q_cond2, q_z2, clf_w2, clf_b2)
    assert logits2.shape == (B2, C2)
    assert jnp.allclose(logits2, ref2, atol=2e-2, rtol=2e-2), (logits2, ref2)

    print("KERNEL_OK")
</pallas_src>

<mosaic_0001>
module attributes {stable_mosaic.version = 11 : i64} {
  func.func @_utterance_decoder_kernel(%arg0: i32, %arg1: i32, %arg2: memref<2x8x32xf32, #tpu.memory_space<vmem>>, %arg3: memref<2x8x32xf32, #tpu.memory_space<vmem>>, %arg4: memref<2x8xf32, #tpu.memory_space<vmem>>, %arg5: memref<2x32xf32, #tpu.memory_space<vmem>>, %arg6: memref<32x128xf32, #tpu.memory_space<vmem>>, %arg7: memref<32x128xf32, #tpu.memory_space<vmem>>, %arg8: memref<1x128xf32, #tpu.memory_space<vmem>>, %arg9: memref<2x128xf32, #tpu.memory_space<vmem>>, %arg10: memref<2x1xf32, #tpu.memory_space<vmem>>, %arg11: memref<2x1xf32, #tpu.memory_space<vmem>>, %arg12: memref<2x32xf32, #tpu.memory_space<vmem>>, %arg13: memref<2x1xf32, #tpu.memory_space<vmem>>, %arg14: memref<2x1xf32, #tpu.memory_space<vmem>>, %arg15: memref<2x32xf32, #tpu.memory_space<vmem>>) attributes {dimension_semantics = [#tpu.dimension_semantics<parallel>, #tpu.dimension_semantics<arbitrary>], iteration_bounds = array<i64: 1, 1>, scalar_prefetch = 0 : i64, scratch_operands = 6 : i64, tpu.core_type = #tpu.core_type<tc>, window_params = [{transform_indices = @transform_0, window_bounds = array<i64: 2, 8, 32>}, {transform_indices = @transform_1, window_bounds = array<i64: 2, 8, 32>}, {transform_indices = @transform_2, window_bounds = array<i64: 2, 8>}, {pipeline_mode = #tpu.pipeline_mode<synchronous>, transform_indices = @transform_3, window_bounds = array<i64: 2, 32>}, {pipeline_mode = #tpu.pipeline_mode<synchronous>, transform_indices = @transform_4, window_bounds = array<i64: 32, 128>}, {pipeline_mode = #tpu.pipeline_mode<synchronous>, transform_indices = @transform_5, window_bounds = array<i64: 32, 128>}, {pipeline_mode = #tpu.pipeline_mode<synchronous>, transform_indices = @transform_6, window_bounds = array<i64: 1, 128>}, {transform_indices = @transform_7, window_bounds = array<i64: 2, 128>}]} {
    %c0_i32 = arith.constant 0 : i32
    %0 = arith.cmpi eq, %arg1, %c0_i32 : i32
    %1 = arith.extui %0 : i1 to i32
    %cst = arith.constant -1.000000e+30 : f32
    %c0_i32_0 = arith.constant 0 : i32
    %2 = arith.cmpi ne, %1, %c0_i32_0 : i32
    scf.if %2 {
      %77 = vector.broadcast %cst : f32 to vector<2x1xf32>
      %c0_49 = arith.constant 0 : index
      %c0_50 = arith.constant 0 : index
      %78 = vector.load %arg10[%c0_49, %c0_50] : memref<2x1xf32, #tpu.memory_space<vmem>>, vector<2x1xf32>
      tpu.vector_store %arg10[%c0_49, %c0_50], %77 {strides = array<i32>} : memref<2x1xf32, #tpu.memory_space<vmem>>, vector<2x1xf32>,
      %79 = vector.broadcast %cst : f32 to vector<2x1xf32>
      %c0_51 = arith.constant 0 : index
      %c0_52 = arith.constant 0 : index
      %80 = vector.load %arg13[%c0_51, %c0_52] : memref<2x1xf32, #tpu.memory_space<vmem>>, vector<2x1xf32>
      tpu.vector_store %arg13[%c0_51, %c0_52], %79 {strides = array<i32>} : memref<2x1xf32, #tpu.memory_space<vmem>>, vector<2x1xf32>,
      %cst_53 = arith.constant 0.000000e+00 : f32
      %81 = vector.broadcast %cst_53 : f32 to vector<2x1xf32>
      %c0_54 = arith.constant 0 : index
      %c0_55 = arith.constant 0 : index
      %82 = vector.load %arg11[%c0_54, %c0_55] : memref<2x1xf32, #tpu.memory_space<vmem>>, vector<2x1xf32>
      tpu.vector_store %arg11[%c0_54, %c0_55], %81 {strides = array<i32>} : memref<2x1xf32, #tpu.memory_space<vmem>>, vector<2x1xf32>,
      %cst_56 = arith.constant 0.000000e+00 : f32
      %83 = vector.broadcast %cst_56 : f32 to vector<2x1xf32>
      %c0_57 = arith.constant 0 : index
      %c0_58 = arith.constant 0 : index
      %84 = vector.load %arg14[%c0_57, %c0_58] : memref<2x1xf32, #tpu.memory_space<vmem>>, vector<2x1xf32>
      tpu.vector_store %arg14[%c0_57, %c0_58], %83 {strides = array<i32>} : memref<2x1xf32, #tpu.memory_space<vmem>>, vector<2x1xf32>,
      %cst_59 = arith.constant 0.000000e+00 : f32
      %85 = vector.broadcast %cst_59 : f32 to vector<2x32xf32>
      %c0_60 = arith.constant 0 : index
      %c0_61 = arith.constant 0 : index
      %86 = vector.load %arg12[%c0_60, %c0_61] : memref<2x32xf32, #tpu.memory_space<vmem>>, vector<2x32xf32>
      tpu.vector_store %arg12[%c0_60, %c0_61], %85 {strides = array<i32>} : memref<2x32xf32, #tpu.memory_space<vmem>>, vector<2x32xf32>,
      %cst_62 = arith.constant 0.000000e+00 : f32
      %87 = vector.broadcast %cst_62 : f32 to vector<2x32xf32>
      %c0_63 = arith.constant 0 : index
      %c0_64 = arith.constant 0 : index
      %88 = vector.load %arg15[%c0_63, %c0_64] : memref<2x32xf32, #tpu.memory_space<vmem>>, vector<2x32xf32>
      tpu.vector_store %arg15[%c0_63, %c0_64], %87 {strides = array<i32>} : memref<2x32xf32, #tpu.memory_space<vmem>>, vector<2x32xf32>,
    } else {
    }
    %c0 = arith.constant 0 : index
    %c0_1 = arith.constant 0 : index
    %3 = vector.load %arg4[%c0, %c0_1] : memref<2x8xf32, #tpu.memory_space<vmem>>, vector<2x8xf32>
    %cst_2 = arith.constant 5.000000e-01 : f32
    %4 = vector.broadcast %cst_2 : f32 to vector<2x8xf32>
    %5 = arith.cmpf ogt, %3, %4 : vector<2x8xf32>
    %c0_3 = arith.constant 0 : index
    %c0_4 = arith.constant 0 : index
    %6 = vector.load %arg5[%c0_3, %c0_4] : memref<2x32xf32, #tpu.memory_space<vmem>>, vector<2x32xf32>
    %7 = vector.shape_cast %6 : vector<2x32xf32> to vector<1x2x32xf32>
    %8 = vector.shape_cast %7 : vector<1x2x32xf32> to vector<1x2x32xf32>
    %9 = vector.broadcast %8 : vector<1x2x32xf32> to vector<2x2x32xf32>
    %c0_5 = arith.constant 0 : index
    %c0_6 = arith.constant 0 : index
    %c0_7 = arith.constant 0 : index
    %10 = vector.load %arg2[%c0_5, %c0_6, %c0_7] : memref<2x8x32xf32, #tpu.memory_space<vmem>>, vector<2x8x32xf32>
    %11 = vector.extract_strided_slice %9 {offsets = [0, 0, 0], sizes = [2, 1, 32], strides = [1, 1, 1]} : vector<2x2x32xf32> to vector<2x1x32xf32>
    "tpu.trace_start"() <{level = 10 : i32, message = "bqd,bkd->bqk"}> : () -> ()
    %cst_8 = arith.constant dense<0.000000e+00> : vector<2x1x8xf32>
    %12 = tpu.matmul %11, %10, %cst_8 {dimension_numbers = #tpu.dot_dimension_numbers<[2], [2], [1], [1], [0, 0, 0, 1, 1, 1], [0], [0]>} : vector<2x1x32xf32>, vector<2x8x32xf32>, vector<2x1x8xf32> -> vector<2x1x8xf32>
    "tpu.trace_stop"() : () -> ()
    %13 = vector.shape_cast %12 : vector<2x1x8xf32> to vector<2x8xf32>
    %cst_9 = arith.constant -1.000000e+30 : f32
    %14 = vector.broadcast %cst_9 : f32 to vector<2x8xf32>
    %15 = arith.select %5, %13, %14 : vector<2x8xi1>, vector<2x8xf32>
    %c0_10 = arith.constant 0 : index
    %c0_11 = arith.constant 0 : index
    %16 = vector.load %arg10[%c0_10, %c0_11] : memref<2x1xf32, #tpu.memory_space<vmem>>, vector<2x1xf32>
    %cst_12 = arith.constant dense<0xFF800000> : vector<2xf32>
    %17 = vector.multi_reduction <maximumf>, %15, %cst_12 [1] : vector<2x8xf32> to vector<2xf32>
    %18 = vector.shape_cast %17 : vector<2xf32> to vector<2x1xf32>
    %19 = arith.maximumf %16, %18 : vector<2x1xf32>
    %20 = arith.subf %16, %19 : vector<2x1xf32>
    %21 = math.exp %20 : vector<2x1xf32>
    %22 = vector.broadcast %19 : vector<2x1xf32> to vector<2x8xf32>
    %23 = arith.subf %15, %22 : vector<2x8xf32>
    %24 = math.exp %23 : vector<2x8xf32>
    %cst_13 = arith.constant 0.000000e+00 : f32
    %25 = vector.broadcast %cst_13 : f32 to vector<2x8xf32>
    %26 = arith.select %5, %24, %25 : vector<2x8xi1>, vector<2x8xf32>
    %c0_14 = arith.constant 0 : index
    %c0_15 = arith.constant 0 : index
    %27 = vector.load %arg11[%c0_14, %c0_15] : memref<2x1xf32, #tpu.memory_space<vmem>>, vector<2x1xf32>
    %28 = arith.mulf %21, %27 : vector<2x1xf32>
    %cst_16 = arith.constant dense<0.000000e+00> : vector<2xf32>
    %29 = vector.multi_reduction <add>, %26, %cst_16 [1] : vector<2x8xf32> to vector<2xf32>
    %30 = vector.shape_cast %29 : vector<2xf32> to vector<2x1xf32>
    %31 = arith.addf %28, %30 : vector<2x1xf32>
    %c0_17 = arith.constant 0 : index
    %c0_18 = arith.constant 0 : index
    %32 = vector.load %arg11[%c0_17, %c0_18] : memref<2x1xf32, #tpu.memory_space<vmem>>, vector<2x1xf32>
    tpu.vector_store %arg11[%c0_17, %c0_18], %31 {strides = array<i32>} : memref<2x1xf32, #tpu.memory_space<vmem>>, vector<2x1xf32>,
    %33 = vector.shape_cast %26 : vector<2x8xf32> to vector<2x1x8xf32>
    "tpu.trace_start"() <{level = 10 : i32, message = "bqk,bkd->bqd"}> : () -> ()
    %cst_19 = arith.constant dense<0.000000e+00> : vector<2x1x32xf32>
    %34 = tpu.matmul %33, %10, %cst_19 {dimension_numbers = #tpu.dot_dimension_numbers<[2], [1], [1], [2], [0, 0, 0, 1, 1, 2], [0], [0]>} : vector<2x1x8xf32>, vector<2x8x32xf32>, vector<2x1x32xf32> -> vector<2x1x32xf32>
    "tpu.trace_stop"() : () -> ()
    %35 = vector.shape_cast %34 : vector<2x1x32xf32> to vector<2x32xf32>
    %c0_20 = arith.constant 0 : index
    %c0_21 = arith.constant 0 : index
    %36 = vector.load %arg12[%c0_20, %c0_21] : memref<2x32xf32, #tpu.memory_space<vmem>>, vector<2x32xf32>
    %37 = vector.broadcast %21 : vector<2x1xf32> to vector<2x32xf32>
    %38 = arith.mulf %37, %36 : vector<2x32xf32>
    %39 = arith.addf %38, %35 : vector<2x32xf32>
    %c0_22 = arith.constant 0 : index
    %c0_23 = arith.constant 0 : index
    %40 = vector.load %arg12[%c0_22, %c0_23] : memref<2x32xf32, #tpu.memory_space<vmem>>, vector<2x32xf32>
    tpu.vector_store %arg12[%c0_22, %c0_23], %39 {strides = array<i32>} : memref<2x32xf32, #tpu.memory_space<vmem>>, vector<2x32xf32>,
    %c0_24 = arith.constant 0 : index
    %c0_25 = arith.constant 0 : index
    %41 = vector.load %arg10[%c0_24, %c0_25] : memref<2x1xf32, #tpu.memory_space<vmem>>, vector<2x1xf32>
    tpu.vector_store %arg10[%c0_24, %c0_25], %19 {strides = array<i32>} : memref<2x1xf32, #tpu.memory_space<vmem>>, vector<2x1xf32>,
    %c0_26 = arith.constant 0 : index
    %c0_27 = arith.constant 0 : index
    %c0_28 = arith.constant 0 : index
    %42 = vector.load %arg3[%c0_26, %c0_27, %c0_28] : memref<2x8x32xf32, #tpu.memory_space<vmem>>, vector<2x8x32xf32>
    %43 = vector.extract_strided_slice %9 {offsets = [0, 1, 0], sizes = [2, 1, 32], strides = [1, 1, 1]} : vector<2x2x32xf32> to vector<2x1x32xf32>
    "tpu.trace_start"() <{level = 10 : i32, message = "bqd,bkd->bqk"}> : () -> ()
    %cst_29 = arith.constant dense<0.000000e+00> : vector<2x1x8xf32>
    %44 = tpu.matmul %43, %42, %cst_29 {dimension_numbers = #tpu.dot_dimension_numbers<[2], [2], [1], [1], [0, 0, 0, 1, 1, 1], [0], [0]>} : vector<2x1x32xf32>, vector<2x8x32xf32>, vector<2x1x8xf32> -> vector<2x1x8xf32>
    "tpu.trace_stop"() : () -> ()
    %45 = vector.shape_cast %44 : vector<2x1x8xf32> to vector<2x8xf32>
    %cst_30 = arith.constant -1.000000e+30 : f32
    %46 = vector.broadcast %cst_30 : f32 to vector<2x8xf32>
    %47 = arith.select %5, %45, %46 : vector<2x8xi1>, vector<2x8xf32>
    %c0_31 = arith.constant 0 : index
    %c0_32 = arith.constant 0 : index
    %48 = vector.load %arg13[%c0_31, %c0_32] : memref<2x1xf32, #tpu.memory_space<vmem>>, vector<2x1xf32>
    %cst_33 = arith.constant dense<0xFF800000> : vector<2xf32>
    %49 = vector.multi_reduction <maximumf>, %47, %cst_33 [1] : vector<2x8xf32> to vector<2xf32>
    %50 = vector.shape_cast %49 : vector<2xf32> to vector<2x1xf32>
    %51 = arith.maximumf %48, %50 : vector<2x1xf32>
    %52 = arith.subf %48, %51 : vector<2x1xf32>
    %53 = math.exp %52 : vector<2x1xf32>
    %54 = vector.broadcast %51 : vector<2x1xf32> to vector<2x8xf32>
    %55 = arith.subf %47, %54 : vector<2x8xf32>
    %56 = math.exp %55 : vector<2x8xf32>
    %cst_34 = arith.constant 0.000000e+00 : f32
    %57 = vector.broadcast %cst_34 : f32 to vector<2x8xf32>
    %58 = arith.select %5, %56, %57 : vector<2x8xi1>, vector<2x8xf32>
    %c0_35 = arith.constant 0 : index
    %c0_36 = arith.constant 0 : index
    %59 = vector.load %arg14[%c0_35, %c0_36] : memref<2x1xf32, #tpu.memory_space<vmem>>, vector<2x1xf32>
    %60 = arith.mulf %53, %59 : vector<2x1xf32>
    %cst_37 = arith.constant dense<0.000000e+00> : vector<2xf32>
    %61 = vector.multi_reduction <add>, %58, %cst_37 [1] : vector<2x8xf32> to vector<2xf32>
    %62 = vector.shape_cast %61 : vector<2xf32> to vector<2x1xf32>
    %63 = arith.addf %60, %62 : vector<2x1xf32>
    %c0_38 = arith.constant 0 : index
    %c0_39 = arith.constant 0 : index
    %64 = vector.load %arg14[%c0_38, %c0_39] : memref<2x1xf32, #tpu.memory_space<vmem>>, vector<2x1xf32>
    tpu.vector_store %arg14[%c0_38, %c0_39], %63 {strides = array<i32>} : memref<2x1xf32, #tpu.memory_space<vmem>>, vector<2x1xf32>,
    %65 = vector.shape_cast %58 : vector<2x8xf32> to vector<2x1x8xf32>
    "tpu.trace_start"() <{level = 10 : i32, message = "bqk,bkd->bqd"}> : () -> ()
    %cst_40 = arith.constant dense<0.000000e+00> : vector<2x1x32xf32>
    %66 = tpu.matmul %65, %42, %cst_40 {dimension_numbers = #tpu.dot_dimension_numbers<[2], [1], [1], [2], [0, 0, 0, 1, 1, 2], [0], [0]>} : vector<2x1x8xf32>, vector<2x8x32xf32>, vector<2x1x32xf32> -> vector<2x1x32xf32>
    "tpu.trace_stop"() : () -> ()
    %67 = vector.shape_cast %66 : vector<2x1x32xf32> to vector<2x32xf32>
    %c0_41 = arith.constant 0 : index
    %c0_42 = arith.constant 0 : index
    %68 = vector.load %arg15[%c0_41, %c0_42] : memref<2x32xf32, #tpu.memory_space<vmem>>, vector<2x32xf32>
    %69 = vector.broadcast %53 : vector<2x1xf32> to vector<2x32xf32>
    %70 = arith.mulf %69, %68 : vector<2x32xf32>
    %71 = arith.addf %70, %67 : vector<2x32xf32>
    %c0_43 = arith.constant 0 : index
    %c0_44 = arith.constant 0 : index
    %72 = vector.load %arg15[%c0_43, %c0_44] : memref<2x32xf32, #tpu.memory_space<vmem>>, vector<2x32xf32>
    tpu.vector_store %arg15[%c0_43, %c0_44], %71 {strides = array<i32>} : memref<2x32xf32, #tpu.memory_space<vmem>>, vector<2x32xf32>,
    %c0_45 = arith.constant 0 : index
    %c0_46 = arith.constant 0 : index
    %73 = vector.load %arg13[%c0_45, %c0_46] : memref<2x1xf32, #tpu.memory_space<vmem>>, vector<2x1xf32>
    tpu.vector_store %arg13[%c0_45, %c0_46], %51 {strides = array<i32>} : memref<2x1xf32, #tpu.memory_space<vmem>>, vector<2x1xf32>,
    %c0_i32_47 = arith.constant 0 : i32
    %74 = arith.cmpi eq, %arg1, %c0_i32_47 : i32
    %75 = arith.extui %74 : i1 to i32
    %c0_i32_48 = arith.constant 0 : i32
    %76 = arith.cmpi ne, %75, %c0_i32_48 : i32
    scf.if %76 {
      %c0_49 = arith.constant 0 : index
      %c0_50 = arith.constant 0 : index
      %77 = vector.load %arg12[%c0_49, %c0_50] : memref<2x32xf32, #tpu.memory_space<vmem>>, vector<2x32xf32>
      %c0_51 = arith.constant 0 : index
      %c0_52 = arith.constant 0 : index
      %78 = vector.load %arg11[%c0_51, %c0_52] : memref<2x1xf32, #tpu.memory_space<vmem>>, vector<2x1xf32>
      %79 = tpu.reciprocal %78 : vector<2x1xf32> -> vector<2x1xf32>
      %80 = vector.broadcast %79 : vector<2x1xf32> to vector<2x32xf32>
      %81 = arith.mulf %77, %80 : vector<2x32xf32>
      %c0_53 = arith.constant 0 : index
      %c0_54 = arith.constant 0 : index
      %82 = vector.load %arg15[%c0_53, %c0_54] : memref<2x32xf32, #tpu.memory_space<vmem>>, vector<2x32xf32>
      %c0_55 = arith.constant 0 : index
      %c0_56 = arith.constant 0 : index
      %83 = vector.load %arg14[%c0_55, %c0_56] : memref<2x1xf32, #tpu.memory_space<vmem>>, vector<2x1xf32>
      %84 = tpu.reciprocal %83 : vector<2x1xf32> -> vector<2x1xf32>
      %85 = vector.broadcast %84 : vector<2x1xf32> to vector<2x32xf32>
      %86 = arith.mulf %82, %85 : vector<2x32xf32>
      %c0_57 = arith.constant 0 : index
      %c0_58 = arith.constant 0 : index
      %87 = vector.load %arg6[%c0_57, %c0_58] : memref<32x128xf32, #tpu.memory_space<vmem>>, vector<32x128xf32>
      %cst_59 = arith.constant dense<0.000000e+00> : vector<2x128xf32>
      %88 = tpu.matmul %81, %87, %cst_59 {dimension_numbers = #tpu.dot_dimension_numbers<[1], [0], [0], [1], [0, 0, 1, 1], [], []>} : vector<2x32xf32>, vector<32x128xf32>, vector<2x128xf32> -> vector<2x128xf32>
      %c0_60 = arith.constant 0 : index
      %c0_61 = arith.constant 0 : index
      %89 = vector.load %arg7[%c0_60, %c0_61] : memref<32x128xf32, #tpu.memory_space<vmem>>, vector<32x128xf32>
      %cst_62 = arith.constant dense<0.000000e+00> : vector<2x128xf32>
      %90 = tpu.matmul %86, %89, %cst_62 {dimension_numbers = #tpu.dot_dimension_numbers<[1], [0], [0], [1], [0, 0, 1, 1], [], []>} : vector<2x32xf32>, vector<32x128xf32>, vector<2x128xf32> -> vector<2x128xf32>
      %91 = arith.addf %88, %90 : vector<2x128xf32>
      %c0_63 = arith.constant 0 : index
      %c0_64 = arith.constant 0 : index
      %92 = vector.load %arg8[%c0_63, %c0_64] : memref<1x128xf32, #tpu.memory_space<vmem>>, vector<1x128xf32>
      %93 = vector.broadcast %92 : vector<1x128xf32> to vector<2x128xf32>
      %94 = arith.addf %91, %93 : vector<2x128xf32>
      %c0_65 = arith.constant 0 : index
      %c0_66 = arith.constant 0 : index
      %95 = vector.load %arg9[%c0_65, %c0_66] : memref<2x128xf32, #tpu.memory_space<vmem>>, vector<2x128xf32>
      tpu.vector_store %arg9[%c0_65, %c0_66], %94 {strides = array<i32>} : memref<2x128xf32, #tpu.memory_space<vmem>>, vector<2x128xf32>,
    } else {
    }
    return
  }
  func.func @transform_0(%arg0: i32, %arg1: i32) -> (i32, i32, i32) {
    %c0_i32 = arith.constant 0 : i32
    %c0_i32_0 = arith.constant 0 : i32
    return %arg0, %arg1, %c0_i32 : i32, i32, i32
  }
  func.func @transform_1(%arg0: i32, %arg1: i32) -> (i32, i32, i32) {
    %c0_i32 = arith.constant 0 : i32
    %c0_i32_0 = arith.constant 0 : i32
    return %arg0, %arg1, %c0_i32 : i32, i32, i32
  }
  func.func @transform_2(%arg0: i32, %arg1: i32) -> (i32, i32) {
    %c0_i32 = arith.constant 0 : i32
    return %arg0, %arg1 : i32, i32
  }
  func.func @transform_3(%arg0: i32, %arg1: i32) -> (i32, i32) {
    %c0_i32 = arith.constant 0 : i32
    %c0_i32_0 = arith.constant 0 : i32
    %c0_i32_1 = arith.constant 0 : i32
    return %c0_i32, %c0_i32_0 : i32, i32
  }
  func.func @transform_4(%arg0: i32, %arg1: i32) -> (i32, i32) {
    %c0_i32 = arith.constant 0 : i32
    %c0_i32_0 = arith.constant 0 : i32
    %c0_i32_1 = arith.constant 0 : i32
    return %c0_i32, %c0_i32_0 : i32, i32
  }
  func.func @transform_5(%arg0: i32, %arg1: i32) -> (i32, i32) {
    %c0_i32 = arith.constant 0 : i32
    %c0_i32_0 = arith.constant 0 : i32
    %c0_i32_1 = arith.constant 0 : i32
    return %c0_i32, %c0_i32_0 : i32, i32
  }
  func.func @transform_6(%arg0: i32, %arg1: i32) -> (i32, i32) {
    %c0_i32 = arith.constant 0 : i32
    %c0_i32_0 = arith.constant 0 : i32
    %c0_i32_1 = arith.constant 0 : i32
    return %c0_i32, %c0_i32_0 : i32, i32
  }
  func.func @transform_7(%arg0: i32, %arg1: i32) -> (i32, i32) {
    %c0_i32 = arith.constant 0 : i32
    %c0_i32_0 = arith.constant 0 : i32
    return %arg0, %c0_i32 : i32, i32
  }
}

</mosaic_0001>

<bundles_post_ra>
// kernel: tpu_custom_call.1
= control target key start
LH: loop header
LB: loop body
LE: loop exit
PB: predicated region body
PF: predicated region fallthrough
CT: control target
= control target key end

     0   :  { %12 = vsyncpa [#allocation9], 0  ;;  %s1453_s0 = inlined_call_operand.hbm [shape: f32[2,8,32], index: 0, kind: input, shape index: {}]   ;;  %s1454_s1 = inlined_call_operand.hbm [shape: f32[2,8,32], index: 1, kind: input, shape index: {}]   ;;  %s1455_s2 = inlined_call_operand.vmem [shape: f32[2,8], index: 2, kind: input, shape index: {}]   ;;  %s1456_s3 = inlined_call_operand.vmem [shape: f32[2,32], index: 3, kind: input, shape index: {}]   ;;  %s1457_s4 = inlined_call_operand.hbm [shape: f32[32,128], index: 4, kind: input, shape index: {}]   ;;  %s1458_s5 = inlined_call_operand.hbm [shape: f32[32,128], index: 5, kind: input, shape index: {}]   ;;  %s1459_s6 = inlined_call_operand.vmem [shape: f32[1,128], index: 6, kind: input, shape index: {}]   ;;  %s1460_s7 = inlined_call_operand.hbm [shape: f32[2,128], index: 7, kind: output, shape index: {}]  }
   0x1   :  { %13 = vsyncpa [#allocation12], 0 }
   0x2   :  { %14 = vsyncpa [#allocation15], 0 }
   0x3   :  { %15 = vsyncpa [#allocation10], 0  ;;  %s1267_s24 = smov [#allocation11]   ;;  %s1268_s26 = smov [#allocation8]  }
   0x4   :  { %s33_s25 = sshll.u32 %s1267_s24, 4  ;;  %s21_s27 = sshll.u32 %s1268_s26, 4  ;;  %s34_s25 = int_to_ptr.vmem [resolvable:$true] %s33_s25  ;;  %s22_s27 = int_to_ptr.vmem [resolvable:$true] %s21_s27 }
   0x5   :  { %s1167_s28 = scalar_lea.vmem %s34_s25, 256  ;;  %p1172_p1 = scmp.lt.s32.totalorder %s34_s25, %s34_s25 }
   0x6   :  { %p1168_p0 = scmp.ne.s32.totalorder %s34_s25, %s1167_s28  ;;  %p1173_p2 = scmp.lt.s32.totalorder %s1167_s28, %s1167_s28 }
   0x8   :  { %p1174_p3 = por %p1173_p2, %p1172_p1 }
   0xa   :  { %p1175_p4 = pnand %p1174_p3, %p1168_p0 }
   0xc   :  { %1178 = shalt.err (!%p1175_p4)
}
   0xd   :  { %s1269_s29 = smov 128   ;;  %s1270_s30 = smov 8  }
   0xe   :  { %39 = dma.hbm_to_vmem [thread:$0]  %s1454_s1, 256, %s34_s25, [#allocation12], %s1269_s29, %s1269_s29, %s1270_s30  }
   0xf   :  { %s1187_s10 = scalar_lea.vmem %s22_s27, 256  ;;  %p1192_p6 = scmp.lt.s32.totalorder %s22_s27, %s22_s27 }
  0x10   :  { %p1188_p5 = scmp.ne.s32.totalorder %s22_s27, %s1187_s10  ;;  %p1193_p7 = scmp.lt.s32.totalorder %s1187_s10, %s1187_s10 }
  0x12   :  { %p1194_p8 = por %p1193_p7, %p1192_p6 }
  0x14   :  { %p1195_p9 = pnand %p1194_p8, %p1188_p5 }
  0x16   :  { %1198 = shalt.err (!%p1195_p9)
}
  0x17   :  { %27 = dma.hbm_to_vmem [thread:$0]  %s1453_s0, 256, %s22_s27, [#allocation9], %s1269_s29, %s1269_s29, %s1270_s30  }
  0x18   :  { %s1271_s13 = smov [#allocation13]   ;;  %s1272_s15 = smov [#allocation14]  }
  0x19   :  { %s49_s14 = sshll.u32 %s1271_s13, 4  ;;  %s61_s16 = sshll.u32 %s1272_s15, 4  ;;  %s50_s14 = int_to_ptr.vmem [resolvable:$true] %s49_s14  ;;  %s62_s16 = int_to_ptr.vmem [resolvable:$true] %s61_s16 }
  0x1a   :  { %s1207_s1 = scalar_lea.vmem %s50_s14, 512  ;;  %p1212_p11 = scmp.lt.s32.totalorder %s50_s14, %s50_s14 }
  0x1b   :  { %p1208_p10 = scmp.ne.s32.totalorder %s50_s14, %s1207_s1  ;;  %p1213_p12 = scmp.lt.s32.totalorder %s1207_s1, %s1207_s1 }
  0x1d   :  { %p1214_p13 = por %p1213_p12, %p1212_p11 }
  0x1f   :  { %p1215_p0 = pnand %p1214_p13, %p1208_p10 }
  0x21   :  { %1218 = shalt.err (!%p1215_p0)
}
  0x22   :  { %55 = dma.hbm_to_vmem [thread:$0]  %s1457_s4, 512, %s50_s14, [#allocation12], %s1269_s29, %s1269_s29, %s1270_s30  }
  0x23   :  { %s1227_s0 = scalar_lea.vmem %s62_s16, 512  ;;  %p1232_p2 = scmp.lt.s32.totalorder %s62_s16, %s62_s16 }
  0x24   :  { %p1228_p1 = scmp.ne.s32.totalorder %s62_s16, %s1227_s0  ;;  %p1233_p3 = scmp.lt.s32.totalorder %s1227_s0, %s1227_s0 }
  0x26   :  { %p1234_p4 = por %p1233_p3, %p1232_p2 }
  0x28   :  { %p1235_p5 = pnand %p1234_p4, %p1228_p1 }
  0x2a   :  { %1238 = shalt.err (!%p1235_p5)
}
  0x2b   :  { %67 = dma.hbm_to_vmem [thread:$0]  %s1458_s5, 512, %s62_s16, [#allocation15], %s1269_s29, %s1269_s29, %s1270_s30  }
  0x2c   :  { %1259 = dma.done.wait [#allocation9], 256  }
  0x2d   :  { %1260 = vsyncadd [#allocation9], 4294967040 }
  0x2e   :  { %1261 = dma.done.wait [#allocation12], 768  }
  0x2f   :  { %1262 = vsyncadd [#allocation12], 4294966528 }
  0x30   :  { %1263 = dma.done.wait [#allocation15], 512  }
  0x31   :  { %1264 = vsyncadd [#allocation15], 4294966784  ;;  %v1273_v0 = vmov 0.0   ;;  %vm1274_vm0 = vmmov 0   ;;  %vm99_vm1 = vcmask 261120   ;;  %v97_v1 = vld [vmem:[#allocation8] sm:$0xff]  ;;  %v286_v24 = vlaneseq }
  0x32   :  { %1071 = vmatprep.subr.mxu0 %v1273_v0  ;;  %1076 = vmatprep.subr.mxu1 %v1273_v0  ;;  %v98_v2 = vld [vmem:[#allocation8 + $0x8] sm:$0xff]  ;;  %v1354_v3 = vld [vmem:[%s1456_s3] sm:$0x3]  ;;  %vm86_vm2 = vcmask 1024   ;;  %v1275_v4 = vmov -1e+30  }
  0x33   :  { %1073 = vmatprep.mubr.msk.f32.mxu0 %vm1274_vm0, %v1273_v0  ;;  %1078 = vmatprep.mubr.msk.f32.mxu1 %vm1274_vm0, %v1273_v0  ;;  %87 = vst.msk [vmem:[#allocation2] sm:$0x3] %vm86_vm2, %v1275_v4  ;;  %88 = vst.msk [vmem:[#allocation5] sm:$0x3] %vm86_vm2, %v1275_v4  ;;  %v1377_v5 = vld [vmem:[%s1455_s2] sm:$0x3] }
  0x34   :  { %1072 = vmatpush3.xpose.msk.msra.mxu0 %vm99_vm1, %v97_v1  ;;  %1077 = vmatpush3.xpose.msk.msra.mxu1 %vm99_vm1, %v98_v2  ;;  %89 = vst.msk [vmem:[#allocation3] sm:$0x3] %vm86_vm2, %v1273_v0  ;;  %90 = vst.msk [vmem:[#allocation6] sm:$0x3] %vm86_vm2, %v1273_v0  ;;  %vm252_vm3 = vcmask 1041409   ;;  %vm95_vm4 = vcmp.gt.f32.partialorder %v1377_v5, 0.5 }
  0x35   :  { %1086 = vmatprep.subr.mxu1 %v1273_v0  ;;  %1081 = vmatprep.subr.mxu0 %v1273_v0  ;;  %vm257_vm5 = vcmask 58368   ;;  %v1276_v14 = vmov 0   ;;  %v1277_v22 = vmov 1966171168   ;;  %v287_v26 = vshrl.u32 %v286_v24, 7  ;;  %v466_v33 = vld [vmem:[#allocation11] sm:$0xff] }
  0x36   :  { %1145 = vset.pattern.permute.xlu0 %v1276_v14  ;;  %1146 = vset.pattern.permute.xlu1 %v1276_v14  ;;  %v284_v23 = vunpack.c.l.s4 %v1277_v22  ;;  %vm305_vm6 = vcmask 64512   ;;  %v468_v34 = vrot.slane %v1354_v3, 1  ;;  %v467_v36 = vld [vmem:[#allocation11 + $0x8] sm:$0xff]  ;;  %vm91_vm7 = vcmask 254976   ;;  %v856_v22 = vld [vmem:[#allocation14 + $0x10] sm:$0xff]  ;;  %s1278_s23 = smov [#allocation16]  }
  0x37   :  { %1074 = vmatmul.mubr.msk.f32.vlgmr.msra.gmra.mxu0 %vm99_vm1, %v1354_v3  ;;  %1079 = vmatmul.mubr.msk.f32.vlgmr.msra.gmra.mxu1 %vm99_vm1, %v1354_v3  ;;  %92 = vst.msk [vmem:[#allocation4] sm:$0x3] %vm91_vm7, %v1273_v0  ;;  %93 = vst.msk [vmem:[#allocation7] sm:$0x3] %vm91_vm7, %v1273_v0  ;;  %v853_v14 = vld [vmem:[#allocation13 + $0x18] sm:$0xff]  ;;  %s1019_s24 = sshll.u32 %s1278_s23, 4  ;;  %s1020_s24 = int_to_ptr.vmem [resolvable:$true] %s1019_s24 }
  0x38   :  { %1087 = vmatpush3.msra.mxu1 %v98_v2  ;;  %1082 = vmatpush3.msra.mxu0 %v97_v1  ;;  %v285_v25 = vunpack.c.0.s8 %v284_v23  ;;  %v855_v23 = vld [vmem:[#allocation14 + $0x8] sm:$0xff]  ;;  %s1239_s25 = scalar_lea.vmem %s1020_s24, 32  ;;  %p1244_p7 = scmp.lt.s32.totalorder %s1020_s24, %s1020_s24 }
  0x39   :  { %1083 = vmatprep.mubr.msk.f32.mxu0 %vm1274_vm0, %v1273_v0  ;;  %1088 = vmatprep.mubr.msk.f32.mxu1 %vm1274_vm0, %v1273_v0  ;;  %p1240_p6 = scmp.ne.s32.totalorder %s1020_s24, %s1239_s25  ;;  %p1245_p8 = scmp.lt.s32.totalorder %s1239_s25, %s1239_s25 }
  0x3a   :  { %1096 = vmatprep.subr.mxu1 %v1273_v0  ;;  %1091 = vmatprep.subr.mxu0 %v1273_v0  ;;  %v256_v15 = vld [vmem:[#allocation2] sm:$0x3]  ;;  %v1385_v27 = vsub.s32 %v285_v25, %v287_v26  ;;  %v623_v51 = vld [vmem:[#allocation5] sm:$0x3] }
  0x3b   :  { %v274_v5 = vld [vmem:[#allocation3] sm:$0x3]  ;;  %v640_v24 = vld [vmem:[#allocation6] sm:$0x3]  ;;  %p1246_p9 = por %p1245_p8, %p1244_p7 }
  0x3d   :  { %p1247_p10 = pnand %p1246_p9, %p1240_p6 }
  0xf7   :  { %v172_v6 = vpop.f32.mrf.mxu0  ;;  %v245_v7 = vpop.f32.mrf.mxu1 }
  0xf8   :  { %v251_v8 = vrot.slane %v245_v7, 7 }
  0xf9   :  { %v1075_v9 = vpop.f32.mrf.mxu0  ;;  %v1080_v10 = vpop.f32.mrf.mxu1 }
  0xfa   :  { %v253_v11 = vsel %vm252_vm3, %v251_v8, %v172_v6 }
  0xfb   :  { %v255_v12 = vsel %vm95_vm4, %v253_v11, -1e+30  ;;  %v450_v11 = vld [vmem:[#allocation4] sm:$0x3] }
  0xfc   :  { %v258_v13 = vsel %vm257_vm5, %v255_v12, -inf }
  0xfd   :  { %259 = vmax.xlane.f32.xlu0 %v258_v13 }
 0x186   :  { %v260_v16 = vpop.xlane.xlu0 %259 }
 0x187   :  { %v261_v17 = vmax.f32 %v256_v15, %v260_v16 }
 0x189   :  { %v262_v18 = vsub.f32 %v256_v15, %v261_v17  ;;  %465 = vst.msk [vmem:[#allocation2] sm:$0x3] %vm86_vm2, %v261_v17  ;;  %267 = vperm.xlu0 %1145, %v261_v17   ;;  %v852_v15 = vld [vmem:[#allocation13 + $0x10] sm:$0xff]  ;;  %v851_v17 = vld [vmem:[#allocation13 + $0x8] sm:$0xff] }
 0x18b   :  { %v263_v54 = vmul.f32 1.442695, %v262_v18 }
 0x204   :  { %v268_v19 = vpop.permute.xlu0 %267 }
 0x205   :  { %v270_v20 = vsub.f32 %v255_v12, %v268_v19  ;;  %v850_v19 = vld [vmem:[#allocation13] sm:$0xff] }
 0x207   :  { %v271_v21 = vmul.f32 1.442695, %v270_v20 }
 0x209   :  { %1147 = vpow2.f32 %v271_v21  ;;  %v857_v21 = vld [vmem:[#allocation14 + $0x18] sm:$0xff] }
 0x20a   :  { %1149 = vpow2.f32 %v263_v54 }
 0x216   :  { %v1148_v28 = vpop.eup %1147 }
 0x217   :  { %v273_v29 = vsel %vm95_vm4, %v1148_v28, 0.0  ;;  %v1150_v58 = vpop.eup %1149 }
 0x218   :  { %v289_v30 = vrot.slane %v273_v29, %v1385_v27  ;;  %v276_v56 = vsel %vm257_vm5, %v273_v29, 0.0  ;;  %v275_v8 = vmul.f32 %v1150_v58, %v274_v5  ;;  %v854_v29 = vld [vmem:[#allocation14] sm:$0xff] }
 0x21a   :  { %v297_v31 = vrot.slane %v289_v30, %v1385_v27  ;;  %v290_v32 = vcombine.high %v289_v30, %v289_v30 }
 0x21c   :  { %1084 = vmatmul.mubr.msk.f32.vlgmr.msra.gmra.mxu0 %vm305_vm6, %v297_v31  ;;  %v304_v35 = vrot.slane %v290_v32, %v1385_v27 }
 0x21d   :  { %1092 = vmatpush3.xpose.msk.msra.mxu0 %vm99_vm1, %v466_v33  ;;  %1093 = vmatprep.mubr.msk.f32.mxu0 %vm1274_vm0, %v1273_v0 }
 0x21e   :  { %1089 = vmatmul.mubr.msk.f32.vlgmr.msra.gmra.mxu1 %vm305_vm6, %v304_v35  ;;  %1101 = vmatprep.subr.mxu0 %v1273_v0 }
 0x21f   :  { %1097 = vmatpush3.xpose.msk.msra.mxu1 %vm99_vm1, %v467_v36  ;;  %1098 = vmatprep.mubr.msk.f32.mxu1 %vm1274_vm0, %v1273_v0 }
 0x220   :  { %1094 = vmatmul.mubr.msk.f32.vlgmr.msra.gmra.mxu0 %vm99_vm1, %v468_v34  ;;  %1106 = vmatprep.subr.mxu1 %v1273_v0 }
 0x221   :  { %1102 = vmatpush3.msra.mxu0 %v466_v33  ;;  %1103 = vmatprep.mubr.msk.f32.mxu0 %vm1274_vm0, %v1273_v0 }
 0x222   :  { %1099 = vmatmul.mubr.msk.f32.vlgmr.msra.gmra.mxu1 %vm99_vm1, %v468_v34  ;;  %1111 = vmatprep.subr.mxu0 %v1273_v0 }
 0x223   :  { %1107 = vmatpush3.msra.mxu1 %v467_v36  ;;  %1108 = vmatprep.mubr.msk.f32.mxu1 %vm1274_vm0, %v1273_v0 }
 0x224   :  { %1122 = vmatprep.subr.mxu1 %v1273_v0 }
 0x2dc   :  { %v374_v37 = vpop.f32.mrf.mxu0 }
 0x2de   :  { %v1085_v38 = vpop.f32.mrf.mxu0  ;;  %v446_v39 = vpop.f32.mrf.mxu1 }
 0x2df   :  { %v459_v40 = vrot.slane %v446_v39, 7 }
 0x2e0   :  { %v1090_v41 = vpop.f32.mrf.mxu1  ;;  %v540_v42 = vpop.f32.mrf.mxu0 }
 0x2e1   :  { %v460_v43 = vsel %vm252_vm3, %v459_v40, %v374_v37 }
 0x2e2   :  { %v613_v44 = vpop.f32.mrf.mxu1  ;;  %v1095_v45 = vpop.f32.mrf.mxu0 }
 0x2e3   :  { %v619_v46 = vrot.slane %v613_v44, 7 }
 0x2e4   :  { %v1100_v47 = vpop.f32.mrf.mxu1 }
 0x2e5   :  { %v620_v48 = vsel %vm252_vm3, %v619_v46, %v540_v42 }
 0x2e6   :  { %v622_v49 = vsel %vm95_vm4, %v620_v48, -1e+30 }
 0x2e7   :  { %v624_v50 = vsel %vm257_vm5, %v622_v49, -inf }
 0x2e8   :  { %625 = vmax.xlane.f32.xlu1 %v624_v50 }
 0x371   :  { %v626_v52 = vpop.xlane.xlu1 %625 }
 0x372   :  { %v627_v53 = vmax.f32 %v623_v51, %v626_v52 }
 0x374   :  { %828 = vst.msk [vmem:[#allocation5] sm:$0x3] %vm86_vm2, %v627_v53  ;;  %633 = vperm.xlu1 %1146, %v627_v53   ;;  %v628_v55 = vsub.f32 %v623_v51, %v627_v53 }
 0x376   :  { %v629_v57 = vmul.f32 1.442695, %v628_v55 }
 0x378   :  { %1151 = vpow2.f32 %v629_v57 }
 0x385   :  { %v1152_v59 = vpop.eup %1151 }
 0x386   :  { %v641_v25 = vmul.f32 %v1152_v59, %v640_v24 }
 0x398   :  { %277 = vadd.xlane.f32.xlu1 %v276_v56 }
 0x3a9   :  { %453 = vperm.xlu1 %1146, %v1150_v58  }
 0x3ad   :  { %817 = vperm.xlu1 %1146, %v1152_v59  }
 0x3ef   :  { %v634_v60 = vpop.permute.xlu1 %633 }
 0x3f0   :  { %v636_v61 = vsub.f32 %v622_v49, %v634_v60  ;;  %v1044_v49 = vld [vmem:[%s1459_s6] ss:$0 sm:$0xff] }
 0x3f2   :  { %v637_v62 = vmul.f32 1.442695, %v636_v61 }
 0x3f4   :  { %1153 = vpow2.f32 %v637_v62 }
 0x401   :  { %v1154_v63 = vpop.eup %1153 }
 0x402   :  { %v639_v1 = vsel %vm95_vm4, %v1154_v63, 0.0 }
 0x403   :  { %v642_v2 = vsel %vm257_vm5, %v639_v1, 0.0  ;;  %v654_v3 = vrot.slane %v639_v1, %v1385_v27 }
 0x404   :  { %643 = vadd.xlane.f32.xlu0 %v642_v2 }
 0x405   :  { %v655_v4 = vcombine.high %v654_v3, %v654_v3  ;;  %v662_v6 = vrot.slane %v654_v3, %v1385_v27 }
 0x407   :  { %v669_v7 = vrot.slane %v655_v4, %v1385_v27  ;;  %1104 = vmatmul.mubr.msk.f32.vlgmr.msra.gmra.mxu0 %vm305_vm6, %v662_v6 }
 0x408   :  { %1119 = vmatprep.mubr.msk.f32.mxu0 %vm1274_vm0, %v1273_v0  ;;  %1112 = vmatpush3.msra.mxu0 %v857_v21 }
 0x409   :  { %1109 = vmatmul.mubr.msk.f32.vlgmr.msra.gmra.mxu1 %vm305_vm6, %v669_v7  ;;  %1113 = vmatprep.subr.mxu0 %v1273_v0 }
 0x40a   :  { %1130 = vmatprep.mubr.msk.f32.mxu1 %vm1274_vm0, %v1273_v0  ;;  %1123 = vmatpush3.msra.mxu1 %v853_v14 }
 0x40b   :  { %1124 = vmatprep.subr.mxu1 %v1273_v0  ;;  %1114 = vmatpush3.msra.mxu0 %v856_v22 }
 0x40c   :  { %1125 = vmatpush3.msra.mxu1 %v852_v15  ;;  %1115 = vmatprep.subr.mxu0 %v1273_v0 }
 0x40d   :  { %1126 = vmatprep.subr.mxu1 %v1273_v0  ;;  %1116 = vmatpush3.msra.mxu0 %v855_v23 }
 0x40e   :  { %1127 = vmatpush3.msra.mxu1 %v851_v17  ;;  %1117 = vmatprep.subr.mxu0 %v1273_v0 }
 0x40f   :  { %1128 = vmatprep.subr.mxu1 %v1273_v0  ;;  %1118 = vmatpush3.msra.mxu0 %v854_v29  ;;  %v814_v0 = vld [vmem:[#allocation7] sm:$0x3] }
 0x410   :  { %1129 = vmatpush3.msra.mxu1 %v850_v19 }
 0x421   :  { %v278_v9 = vpop.xlane.xlu1 %277 }
 0x422   :  { %v279_v10 = vadd.f32 %v278_v9, %v275_v8 }
 0x424   :  { %281 = vst.msk [vmem:[#allocation3] sm:$0x3] %vm86_vm2, %v279_v10 }
 0x425   :  { %v454_v12 = vpop.permute.xlu1 %453 }
 0x426   :  { %v456_v13 = vmul.f32 %v454_v12, %v450_v11 }
 0x428   :  { %v462_v16 = vadd.f32 %v460_v43, %v456_v13 }
 0x429   :  { %v818_v31 = vpop.permute.xlu1 %817 }
 0x42a   :  { %464 = vst.msk [vmem:[#allocation4] sm:$0x3] %vm91_vm7, %v462_v16  ;;  %v820_v39 = vmul.f32 %v818_v31, %v814_v0 }
 0x42b   :  { %v833_v18 = vld [vmem:[#allocation3] sm:$0x3] }
 0x42c   :  { %1155 = vrcp.f32 %v833_v18 }
 0x431   :  { %v832_v32 = vld [vmem:[#allocation4] sm:$0x3] }
 0x439   :  { %v1156_v20 = vpop.eup %1155 }
 0x43a   :  { %837 = vperm.xlu1 %1146, %v1156_v20  }
 0x48d   :  { %v644_v26 = vpop.xlane.xlu0 %643 }
 0x48e   :  { %v645_v27 = vadd.f32 %v644_v26, %v641_v25 }
 0x490   :  { %646 = vst.msk [vmem:[#allocation6] sm:$0x3] %vm86_vm2, %v645_v27 }
 0x497   :  { %v842_v28 = vld [vmem:[#allocation6] sm:$0x3] }
 0x498   :  { %1157 = vrcp.f32 %v842_v28 }
 0x4a5   :  { %v1158_v30 = vpop.eup %1157 }
 0x4a6   :  { %846 = vperm.xlu0 %1145, %v1158_v30  }
 0x4b5   :  { %v838_v33 = vpop.permute.xlu1 %837 }
 0x4b6   :  { %v840_v34 = vmul.f32 %v838_v33, %v832_v32 }
 0x4b8   :  { %1131 = vmatmul.mubr.msk.f32.vlgmr.msra.gmra.mxu1 %vm99_vm1, %v840_v34 }
 0x4c7   :  { %v738_v35 = vpop.f32.mrf.mxu0 }
 0x4c9   :  { %v1105_v36 = vpop.f32.mrf.mxu0  ;;  %v810_v37 = vpop.f32.mrf.mxu1 }
 0x4ca   :  { %v823_v38 = vrot.slane %v810_v37, 7 }
 0x4cb   :  { %v1110_v40 = vpop.f32.mrf.mxu1 }
 0x4cc   :  { %v824_v41 = vsel %vm252_vm3, %v823_v38, %v738_v35 }
 0x4cd   :  { %v826_v42 = vadd.f32 %v824_v41, %v820_v39 }
 0x4cf   :  { %827 = vst.msk [vmem:[#allocation7] sm:$0x3] %vm91_vm7, %v826_v42 }
 0x4d6   :  { %v841_v44 = vld [vmem:[#allocation7] sm:$0x3] }
 0x521   :  { %v847_v43 = vpop.permute.xlu0 %846 }
 0x522   :  { %v849_v45 = vmul.f32 %v847_v43, %v841_v44 }
 0x524   :  { %1120 = vmatmul.mubr.msk.f32.vlgmr.msra.gmra.mxu0 %vm99_vm1, %v849_v45 }
 0x578   :  { %v1000_v46 = vpop.f32.mrf.mxu1 }
 0x57a   :  { %v1132_v47 = vpop.f32.mrf.mxu1 }
 0x5e4   :  { %v927_v48 = vpop.f32.mrf.mxu0 }
 0x5e5   :  { %v1001_v50 = vadd.f32 %v1000_v46, %v927_v48 }
 0x5e6   :  { %v1121_v51 = vpop.f32.mrf.mxu0 }
 0x5e7   :  { %v1011_v52 = vadd.f32 %v1044_v49, %v1001_v50 }
 0x5e9   :  { %1012 = vst [vmem:[#allocation16] sm:$0x3] %v1011_v52 }
 0x5ea   :  { %1250 = shalt.err (!%p1247_p10)
}
 0x5eb   :  { %1022 = dma.vmem_to_hbm [thread:$0]  %s1020_s24, 32, %s1460_s7, [#allocation10]  }
 0x5ec   :  { %1265 = dma.done.wait [#allocation10], 32  }
 0x5ed   :  { %1266 = vsyncadd [#allocation10], 4294967264 }
 0x5ee   :  { %1026 = vsyncpa [#allocation9], 1 }
 0x5ef   :  { %1027 = vsyncpa [#allocation12], 1 }
 0x5f0   :  { %1028 = vsyncpa [#allocation15], 1 }
 0x5f1   :  { %1029 = vsyncpa [#allocation10], 1 }

</bundles_post_ra>
